<compile_context>
chip_gen: v6e
topology: v6e:2x2x1
jax: 0.10.0
libtpu: 0.0.40
codegen_flags: <defaults>
</compile_context>

<pallas_src>
import functools

import jax
import jax.numpy as jnp
import numpy as np
from jax.experimental import pallas as pl
from jax.experimental.pallas import tpu as pltpu


def _variance_kernel(B, F1, x_ref, w1_ref, w2_ref, p_ref, out_ref):
    eps = 1e-5

    # ---- unpack the coalesced parameter slab (one VMEM tile) ----
    b1  = p_ref[0:1, 0:F1]        # conv1 bias           (1, F1)
    g1  = p_ref[1:2, 0:F1]        # bn1 gamma            (1, F1)
    be1 = p_ref[2:3, 0:F1]        # bn1 beta             (1, F1)
    b2  = p_ref[3:4, :]           # conv2 bias           (1, F2)
    g2  = p_ref[4:5, :]           # bn2 gamma            (1, F2)
    be2 = p_ref[5:6, :]           # bn2 beta             (1, F2)
    wfc = p_ref[6:7, :]           # fc weight row        (1, F2)
    bfc = p_ref[7:8, 0:1]         # fc bias              (1, 1)

    # ---- conv1: both kernel_size=2 windows fused into one matmul ----
    # X rows 0..B-1 = window t=0, rows B..2B-1 = window t=1 (stacked in wrapper).
    H = jnp.dot(x_ref[...], w1_ref[...],
                preferred_element_type=jnp.float32) + b1          # (2B, F1)

    # ---- bn1 (batch stats over batch x 2 time positions), one-pass var, ReLU ----
    n1 = jnp.float32(2 * B)
    mean1 = jnp.sum(H, axis=0, keepdims=True) / n1
    var1 = jnp.sum(H * H, axis=0, keepdims=True) / n1 - mean1 * mean1
    H = jnp.maximum(g1 * (H - mean1) * jax.lax.rsqrt(var1 + eps) + be1, 0.0)

    # ---- conv2 (kernel_size=2 over the 2 remaining time steps), no lane concat ----
    h0 = H[:B, :]                                                  # bn1 output, t=0
    h1 = H[B:, :]                                                  # bn1 output, t=1
    h2 = (jnp.dot(h0, w2_ref[0:F1, :], preferred_element_type=jnp.float32)
          + jnp.dot(h1, w2_ref[F1:2 * F1, :], preferred_element_type=jnp.float32)
          + b2)                                                    # (B, F2)

    # ---- bn2 (single time position -> stats over batch), one-pass var, ReLU ----
    mean2 = jnp.mean(h2, axis=0, keepdims=True)
    var2 = jnp.mean(h2 * h2, axis=0, keepdims=True) - mean2 * mean2
    h2 = jnp.maximum(g2 * (h2 - mean2) * jax.lax.rsqrt(var2 + eps) + be2, 0.0)

    # ---- fc as VPU multiply + lane reduce (avoids an N=1 MXU matmul) ----
    z = jnp.sum(h2 * wfc, axis=-1, keepdims=True) + bfc            # (B, 1)
    # PyTorch Softplus(beta=1, threshold=20) + 1e-6
    sp = jnp.where(z > 20.0, z, jnp.log1p(jnp.exp(jnp.minimum(z, 20.0))))
    out_ref[...] = sp + 1e-6


def variance_model_forward(x, kernel_params):
    """x: (B, C_in, T) float32, T == 3 (time_steps)."""
    w1, w2, pslab = kernel_params
    B, C_in, T = x.shape
    assert T == 3, "this module is built for time_steps=3"
    F1 = w1.shape[1]

    # im2col for conv1 (plain-JAX glue): window t -> (B, C_in*2), ci-major tap-minor,
    # then stack the two windows along the batch (sublane) axis -> one matmul input.
    x0 = x[:, :, 0:2].reshape(B, C_in * 2)
    x1 = x[:, :, 1:3].reshape(B, C_in * 2)
    X = jnp.concatenate([x0, x1], axis=0)                          # (2B, C_in*2)

    vmem = pl.BlockSpec(memory_space=pltpu.MemorySpace.VMEM)
    kernel = functools.partial(_variance_kernel, B, F1)
    return pl.pallas_call(
        kernel,
        out_shape=jax.ShapeDtypeStruct((B, 1), jnp.float32),
        in_specs=[vmem] * 4,
        out_specs=vmem,
    )(X, w1, w2, pslab)


def make_params(key, input_channels=4, time_steps=3, num_filters=32):
    F1, F2 = num_filters, num_filters * 2
    ks = jax.random.split(key, 6)
    # torch layouts: conv1d weight (C_out, C_in, K); linear weight (out, in)
    w1_t = jax.random.normal(ks[0], (F1, input_channels, 2), jnp.float32) * 0.1
    b1_t = jax.random.normal(ks[1], (F1,), jnp.float32) * 0.1
    w2_t = jax.random.normal(ks[2], (F2, F1, 2), jnp.float32) * 0.1
    b2_t = jax.random.normal(ks[3], (F2,), jnp.float32) * 0.1
    wfc_t = jax.random.normal(ks[4], (1, F2 * (time_steps - 2)), jnp.float32) * 0.1
    bfc_t = jax.random.normal(ks[5], (1,), jnp.float32) * 0.1

    # W1_re[ci*2+k, co] = W1[co, ci, k]
    w1 = jnp.transpose(w1_t, (1, 2, 0)).reshape(input_channels * 2, F1)
    # W2_re[t*F1+ci, co] = W2[co, ci, t]  (rows [:F1] = tap 0, rows [F1:] = tap 1)
    w2 = jnp.transpose(w2_t, (2, 1, 0)).reshape(2 * F1, F2)
    wfc_row = wfc_t.reshape(F2)                                    # (F2,)

    # BatchNorm affine params: default init gamma=1, beta=0
    g1 = jnp.ones((F1,), jnp.float32)
    be1 = jnp.zeros((F1,), jnp.float32)
    g2 = jnp.ones((F2,), jnp.float32)
    be2 = jnp.zeros((F2,), jnp.float32)

    # ---- pack all small vectors into one (8, F2) slab (one DMA / one tile) ----
    pslab = jnp.zeros((8, F2), jnp.float32)
    pslab = pslab.at[0, :F1].set(b1_t)
    pslab = pslab.at[1, :F1].set(g1)
    pslab = pslab.at[2, :F1].set(be1)
    pslab = pslab.at[3, :].set(b2_t)
    pslab = pslab.at[4, :].set(g2)
    pslab = pslab.at[5, :].set(be2)
    pslab = pslab.at[6, :].set(wfc_row)
    pslab = pslab.at[7, 0].set(bfc_t[0])

    kernel_params = (w1, w2, pslab)
    ref_params = (w1, b1_t.reshape(1, F1), g1.reshape(1, F1), be1.reshape(1, F1),
                  w2, b2_t.reshape(1, F2), g2.reshape(1, F2), be2.reshape(1, F2),
                  wfc_row.reshape(F2, 1), bfc_t.reshape(1, 1))
    return kernel_params, ref_params


def _reference(x, ref_params):
    """Pure-JAX reference mirroring the PyTorch math (training-mode BN)."""
    w1, b1, g1, be1, w2, b2, g2, be2, wfc, bfc = ref_params
    B, C_in, _ = x.shape
    eps = 1e-5
    x0 = x[:, :, 0:2].reshape(B, C_in * 2)
    x1 = x[:, :, 1:3].reshape(B, C_in * 2)
    h0 = x0 @ w1 + b1
    h1 = x1 @ w1 + b1
    stk = jnp.stack([h0, h1], axis=0)                              # (2, B, F1)
    m = jnp.mean(stk, axis=(0, 1), keepdims=True)
    v = jnp.mean((stk - m) ** 2, axis=(0, 1), keepdims=True)
    stk = jnp.maximum(g1 * (stk - m) / jnp.sqrt(v + eps) + be1, 0.0)
    hcat = jnp.concatenate([stk[0], stk[1]], axis=-1)
    h2 = hcat @ w2 + b2
    m2 = jnp.mean(h2, axis=0, keepdims=True)
    v2 = jnp.mean((h2 - m2) ** 2, axis=0, keepdims=True)
    h2 = jnp.maximum(g2 * (h2 - m2) / jnp.sqrt(v2 + eps) + be2, 0.0)
    z = h2 @ wfc + bfc
    return jnp.where(z > 20.0, z, jnp.log1p(jnp.exp(z))) + 1e-6


if __name__ == "__main__":
    key = jax.random.PRNGKey(0)
    k_x, k_p = jax.random.split(key)

    B, C_in, T, F1 = 2, 4, 3, 32
    x = jax.random.normal(k_x, (B, C_in, T), jnp.float32)
    kernel_params, ref_params = make_params(k_p, input_channels=C_in,
                                            time_steps=T, num_filters=F1)

    out = variance_model_forward(x, kernel_params)
    out = jax.block_until_ready(out)

    ref = _reference(x, ref_params)
    np.testing.assert_allclose(np.asarray(out), np.asarray(ref),
                               rtol=1e-5, atol=1e-5)

    print("KERNEL_OK")
</pallas_src>

<mosaic_0001>
module attributes {stable_mosaic.version = 11 : i64} {
  func.func @_variance_kernel(%arg0: memref<4x8xf32, #tpu.memory_space<vmem>>, %arg1: memref<8x32xf32, #tpu.memory_space<vmem>>, %arg2: memref<64x64xf32, #tpu.memory_space<vmem>>, %arg3: memref<8x64xf32, #tpu.memory_space<vmem>>, %arg4: memref<2x1xf32, #tpu.memory_space<vmem>>) attributes {dimension_semantics = [], scalar_prefetch = 0 : i64, scratch_operands = 0 : i64, tpu.core_type = #tpu.core_type<tc>} {
    %c0 = arith.constant 0 : index
    %c0_0 = arith.constant 0 : index
    %0 = vector.load %arg3[%c0, %c0_0] : memref<8x64xf32, #tpu.memory_space<vmem>>, vector<1x32xf32>
    %c1 = arith.constant 1 : index
    %c0_1 = arith.constant 0 : index
    %1 = vector.load %arg3[%c1, %c0_1] : memref<8x64xf32, #tpu.memory_space<vmem>>, vector<1x32xf32>
    %c2 = arith.constant 2 : index
    %c0_2 = arith.constant 0 : index
    %2 = vector.load %arg3[%c2, %c0_2] : memref<8x64xf32, #tpu.memory_space<vmem>>, vector<1x32xf32>
    %c3 = arith.constant 3 : index
    %c0_3 = arith.constant 0 : index
    %3 = vector.load %arg3[%c3, %c0_3] : memref<8x64xf32, #tpu.memory_space<vmem>>, vector<1x64xf32>
    %c4 = arith.constant 4 : index
    %c0_4 = arith.constant 0 : index
    %4 = vector.load %arg3[%c4, %c0_4] : memref<8x64xf32, #tpu.memory_space<vmem>>, vector<1x64xf32>
    %c5 = arith.constant 5 : index
    %c0_5 = arith.constant 0 : index
    %5 = vector.load %arg3[%c5, %c0_5] : memref<8x64xf32, #tpu.memory_space<vmem>>, vector<1x64xf32>
    %c6 = arith.constant 6 : index
    %c0_6 = arith.constant 0 : index
    %6 = vector.load %arg3[%c6, %c0_6] : memref<8x64xf32, #tpu.memory_space<vmem>>, vector<1x64xf32>
    %c7 = arith.constant 7 : index
    %c0_7 = arith.constant 0 : index
    %7 = vector.load %arg3[%c7, %c0_7] : memref<8x64xf32, #tpu.memory_space<vmem>>, vector<1x1xf32>
    %c0_8 = arith.constant 0 : index
    %c0_9 = arith.constant 0 : index
    %8 = vector.load %arg0[%c0_8, %c0_9] : memref<4x8xf32, #tpu.memory_space<vmem>>, vector<4x8xf32>
    %c0_10 = arith.constant 0 : index
    %c0_11 = arith.constant 0 : index
    %9 = vector.load %arg1[%c0_10, %c0_11] : memref<8x32xf32, #tpu.memory_space<vmem>>, vector<8x32xf32>
    %cst = arith.constant dense<0.000000e+00> : vector<4x32xf32>
    %10 = tpu.matmul %8, %9, %cst {dimension_numbers = #tpu.dot_dimension_numbers<[1], [0], [0], [1], [0, 0, 1, 1], [], []>} : vector<4x8xf32>, vector<8x32xf32>, vector<4x32xf32> -> vector<4x32xf32>
    %11 = vector.broadcast %0 : vector<1x32xf32> to vector<4x32xf32>
    %12 = arith.addf %10, %11 : vector<4x32xf32>
    %cst_12 = arith.constant dense<0.000000e+00> : vector<32xf32>
    %13 = vector.multi_reduction <add>, %12, %cst_12 [0] : vector<4x32xf32> to vector<32xf32>
    %14 = vector.shape_cast %13 : vector<32xf32> to vector<1x32xf32>
    %cst_13 = arith.constant 4.000000e+00 : f32
    %15 = vector.broadcast %cst_13 : f32 to vector<1x32xf32>
    %16 = arith.divf %14, %15 : vector<1x32xf32>
    %17 = arith.mulf %12, %12 : vector<4x32xf32>
    %cst_14 = arith.constant dense<0.000000e+00> : vector<32xf32>
    %18 = vector.multi_reduction <add>, %17, %cst_14 [0] : vector<4x32xf32> to vector<32xf32>
    %19 = vector.shape_cast %18 : vector<32xf32> to vector<1x32xf32>
    %cst_15 = arith.constant 4.000000e+00 : f32
    %20 = vector.broadcast %cst_15 : f32 to vector<1x32xf32>
    %21 = arith.divf %19, %20 : vector<1x32xf32>
    %22 = arith.mulf %16, %16 : vector<1x32xf32>
    %23 = arith.subf %21, %22 : vector<1x32xf32>
    %24 = vector.broadcast %16 : vector<1x32xf32> to vector<4x32xf32>
    %25 = arith.subf %12, %24 : vector<4x32xf32>
    %26 = vector.broadcast %1 : vector<1x32xf32> to vector<4x32xf32>
    %27 = arith.mulf %26, %25 : vector<4x32xf32>
    %cst_16 = arith.constant 9.99999974E-6 : f32
    %28 = vector.broadcast %cst_16 : f32 to vector<1x32xf32>
    %29 = arith.addf %23, %28 : vector<1x32xf32>
    %30 = math.rsqrt %29 : vector<1x32xf32>
    %31 = vector.broadcast %30 : vector<1x32xf32> to vector<4x32xf32>
    %32 = arith.mulf %27, %31 : vector<4x32xf32>
    %33 = vector.broadcast %2 : vector<1x32xf32> to vector<4x32xf32>
    %34 = arith.addf %32, %33 : vector<4x32xf32>
    %cst_17 = arith.constant 0.000000e+00 : f32
    %35 = vector.broadcast %cst_17 : f32 to vector<4x32xf32>
    %36 = arith.maximumf %34, %35 : vector<4x32xf32>
    %37 = vector.extract_strided_slice %36 {offsets = [0, 0], sizes = [2, 32], strides = [1, 1]} : vector<4x32xf32> to vector<2x32xf32>
    %38 = vector.extract_strided_slice %36 {offsets = [2, 0], sizes = [2, 32], strides = [1, 1]} : vector<4x32xf32> to vector<2x32xf32>
    %c0_18 = arith.constant 0 : index
    %c0_19 = arith.constant 0 : index
    %39 = vector.load %arg2[%c0_18, %c0_19] : memref<64x64xf32, #tpu.memory_space<vmem>>, vector<32x64xf32>
    %cst_20 = arith.constant dense<0.000000e+00> : vector<2x64xf32>
    %40 = tpu.matmul %37, %39, %cst_20 {dimension_numbers = #tpu.dot_dimension_numbers<[1], [0], [0], [1], [0, 0, 1, 1], [], []>} : vector<2x32xf32>, vector<32x64xf32>, vector<2x64xf32> -> vector<2x64xf32>
    %c32 = arith.constant 32 : index
    %c0_21 = arith.constant 0 : index
    %41 = vector.load %arg2[%c32, %c0_21] : memref<64x64xf32, #tpu.memory_space<vmem>>, vector<32x64xf32>
    %cst_22 = arith.constant dense<0.000000e+00> : vector<2x64xf32>
    %42 = tpu.matmul %38, %41, %cst_22 {dimension_numbers = #tpu.dot_dimension_numbers<[1], [0], [0], [1], [0, 0, 1, 1], [], []>} : vector<2x32xf32>, vector<32x64xf32>, vector<2x64xf32> -> vector<2x64xf32>
    %43 = arith.addf %40, %42 : vector<2x64xf32>
    %44 = vector.broadcast %3 : vector<1x64xf32> to vector<2x64xf32>
    %45 = arith.addf %43, %44 : vector<2x64xf32>
    %cst_23 = arith.constant dense<0.000000e+00> : vector<64xf32>
    %46 = vector.multi_reduction <add>, %45, %cst_23 [0] : vector<2x64xf32> to vector<64xf32>
    %47 = vector.shape_cast %46 : vector<64xf32> to vector<1x64xf32>
    %cst_24 = arith.constant 2.000000e+00 : f32
    %48 = vector.broadcast %cst_24 : f32 to vector<1x64xf32>
    %49 = arith.divf %47, %48 : vector<1x64xf32>
    %50 = arith.mulf %45, %45 : vector<2x64xf32>
    %cst_25 = arith.constant dense<0.000000e+00> : vector<64xf32>
    %51 = vector.multi_reduction <add>, %50, %cst_25 [0] : vector<2x64xf32> to vector<64xf32>
    %52 = vector.shape_cast %51 : vector<64xf32> to vector<1x64xf32>
    %cst_26 = arith.constant 2.000000e+00 : f32
    %53 = vector.broadcast %cst_26 : f32 to vector<1x64xf32>
    %54 = arith.divf %52, %53 : vector<1x64xf32>
    %55 = arith.mulf %49, %49 : vector<1x64xf32>
    %56 = arith.subf %54, %55 : vector<1x64xf32>
    %57 = vector.broadcast %49 : vector<1x64xf32> to vector<2x64xf32>
    %58 = arith.subf %45, %57 : vector<2x64xf32>
    %59 = vector.broadcast %4 : vector<1x64xf32> to vector<2x64xf32>
    %60 = arith.mulf %59, %58 : vector<2x64xf32>
    %cst_27 = arith.constant 9.99999974E-6 : f32
    %61 = vector.broadcast %cst_27 : f32 to vector<1x64xf32>
    %62 = arith.addf %56, %61 : vector<1x64xf32>
    %63 = math.rsqrt %62 : vector<1x64xf32>
    %64 = vector.broadcast %63 : vector<1x64xf32> to vector<2x64xf32>
    %65 = arith.mulf %60, %64 : vector<2x64xf32>
    %66 = vector.broadcast %5 : vector<1x64xf32> to vector<2x64xf32>
    %67 = arith.addf %65, %66 : vector<2x64xf32>
    %cst_28 = arith.constant 0.000000e+00 : f32
    %68 = vector.broadcast %cst_28 : f32 to vector<2x64xf32>
    %69 = arith.maximumf %67, %68 : vector<2x64xf32>
    %70 = vector.broadcast %6 : vector<1x64xf32> to vector<2x64xf32>
    %71 = arith.mulf %69, %70 : vector<2x64xf32>
    %cst_29 = arith.constant dense<0.000000e+00> : vector<2xf32>
    %72 = vector.multi_reduction <add>, %71, %cst_29 [1] : vector<2x64xf32> to vector<2xf32>
    %73 = vector.shape_cast %72 : vector<2xf32> to vector<2x1xf32>
    %74 = vector.broadcast %7 : vector<1x1xf32> to vector<2x1xf32>
    %75 = arith.addf %73, %74 : vector<2x1xf32>
    %cst_30 = arith.constant 2.000000e+01 : f32
    %76 = vector.broadcast %cst_30 : f32 to vector<2x1xf32>
    %77 = arith.cmpf ogt, %75, %76 : vector<2x1xf32>
    %cst_31 = arith.constant 2.000000e+01 : f32
    %78 = vector.broadcast %cst_31 : f32 to vector<2x1xf32>
    %79 = arith.minimumf %75, %78 : vector<2x1xf32>
    %80 = math.exp %79 : vector<2x1xf32>
    %81 = math.log1p %80 : vector<2x1xf32>
    %82 = arith.select %77, %75, %81 : vector<2x1xi1>, vector<2x1xf32>
    %cst_32 = arith.constant 9.99999997E-7 : f32
    %83 = vector.broadcast %cst_32 : f32 to vector<2x1xf32>
    %84 = arith.addf %82, %83 : vector<2x1xf32>
    %c0_33 = arith.constant 0 : index
    %c0_34 = arith.constant 0 : index
    %85 = vector.load %arg4[%c0_33, %c0_34] : memref<2x1xf32, #tpu.memory_space<vmem>>, vector<2x1xf32>
    tpu.vector_store %arg4[%c0_33, %c0_34], %84 {strides = array<i32>} : memref<2x1xf32, #tpu.memory_space<vmem>>, vector<2x1xf32>,
    return
  }
}

</mosaic_0001>

<bundles_post_ra>
// kernel: tpu_custom_call.1
= control target key start
LH: loop header
LB: loop body
LE: loop exit
PB: predicated region body
PF: predicated region fallthrough
CT: control target
= control target key end

     0   :  { %9 = vsyncpa [#allocation3], 0  ;;  %s626_s0 = inlined_call_operand.hbm [shape: f32[4,8], index: 0, kind: input, shape index: {}]   ;;  %s627_s1 = inlined_call_operand.hbm [shape: f32[8,32], index: 1, kind: input, shape index: {}]   ;;  %s628_s2 = inlined_call_operand.hbm [shape: f32[64,64], index: 2, kind: input, shape index: {}]   ;;  %s629_s3 = inlined_call_operand.hbm [shape: f32[8,64], index: 3, kind: input, shape index: {}]   ;;  %s630_s4 = inlined_call_operand.vmem [shape: f32[2,1], index: 4, kind: output, shape index: {}]  }
   0x1   :  { %10 = vsyncpa [#allocation5], 0 }
   0x2   :  { %11 = vsyncpa [#allocation8], 0  ;;  %s575_s15 = smov [#allocation4]   ;;  %s576_s17 = smov [#allocation2]  }
   0x3   :  { %s28_s16 = sshll.u32 %s575_s15, 4  ;;  %s18_s18 = sshll.u32 %s576_s17, 4  ;;  %s29_s16 = int_to_ptr.vmem [resolvable:$true] %s28_s16  ;;  %s19_s18 = int_to_ptr.vmem [resolvable:$true] %s18_s18 }
   0x4   :  { %s497_s19 = scalar_lea.vmem %s29_s16, 128  ;;  %p502_p1 = scmp.lt.s32.totalorder %s29_s16, %s29_s16 }
   0x5   :  { %p498_p0 = scmp.ne.s32.totalorder %s29_s16, %s497_s19  ;;  %p503_p2 = scmp.lt.s32.totalorder %s497_s19, %s497_s19 }
   0x7   :  { %p504_p3 = por %p503_p2, %p502_p1 }
   0x9   :  { %p505_p4 = pnand %p504_p3, %p498_p0 }
   0xb   :  { %508 = shalt.err (!%p505_p4)
}
   0xc   :  { %31 = dma.hbm_to_vmem [thread:$0]  %s627_s1, 128, %s29_s16, [#allocation5]  }
   0xd   :  { %s517_s22 = scalar_lea.vmem %s19_s18, 64  ;;  %p522_p6 = scmp.lt.s32.totalorder %s19_s18, %s19_s18 }
   0xe   :  { %p518_p5 = scmp.ne.s32.totalorder %s19_s18, %s517_s22  ;;  %p523_p7 = scmp.lt.s32.totalorder %s517_s22, %s517_s22 }
  0x10   :  { %p524_p8 = por %p523_p7, %p522_p6 }
  0x12   :  { %p525_p9 = pnand %p524_p8, %p518_p5 }
  0x14   :  { %528 = shalt.err (!%p525_p9)
}
  0x15   :  { %21 = dma.hbm_to_vmem [thread:$0]  %s626_s0, 64, %s19_s18, [#allocation3]  }
  0x16   :  { %s577_s25 = smov [#allocation6]  }
  0x17   :  { %s37_s26 = sshll.u32 %s577_s25, 4  ;;  %s38_s26 = int_to_ptr.vmem [resolvable:$true] %s37_s26 }
  0x18   :  { %s537_s27 = scalar_lea.vmem %s38_s26, 1024  ;;  %p542_p11 = scmp.lt.s32.totalorder %s38_s26, %s38_s26 }
  0x19   :  { %p538_p10 = scmp.ne.s32.totalorder %s38_s26, %s537_s27  ;;  %p543_p12 = scmp.lt.s32.totalorder %s537_s27, %s537_s27 }
  0x1b   :  { %p544_p13 = por %p543_p12, %p542_p11 }
  0x1d   :  { %p545_p0 = pnand %p544_p13, %p538_p10 }
  0x1f   :  { %548 = shalt.err (!%p545_p0)
}
  0x20   :  { %s578_s1 = smov 128   ;;  %s579_s28 = smov 8  }
  0x21   :  { %43 = dma.hbm_to_vmem [thread:$0]  %s628_s2, 1024, %s38_s26, [#allocation5], %s578_s1, %s578_s1, %s579_s28  }
  0x22   :  { %s580_s5 = smov [#allocation7]  }
  0x23   :  { %s50_s6 = sshll.u32 %s580_s5, 4  ;;  %s51_s6 = int_to_ptr.vmem [resolvable:$true] %s50_s6 }
  0x24   :  { %s557_s0 = scalar_lea.vmem %s51_s6, 128  ;;  %p562_p2 = scmp.lt.s32.totalorder %s51_s6, %s51_s6 }
  0x25   :  { %p558_p1 = scmp.ne.s32.totalorder %s51_s6, %s557_s0  ;;  %p563_p3 = scmp.lt.s32.totalorder %s557_s0, %s557_s0 }
  0x27   :  { %p564_p4 = por %p563_p3, %p562_p2 }
  0x29   :  { %p565_p5 = pnand %p564_p4, %p558_p1 }
  0x2b   :  { %568 = shalt.err (!%p565_p5)
}
  0x2c   :  { %53 = dma.hbm_to_vmem [thread:$0]  %s629_s3, 128, %s51_s6, [#allocation8]  }
  0x2d   :  { %569 = dma.done.wait [#allocation3], 64  }
  0x2e   :  { %570 = vsyncadd [#allocation3], 4294967232 }
  0x2f   :  { %571 = dma.done.wait [#allocation5], 1152  }
  0x30   :  { %572 = vsyncadd [#allocation5], 4294966144 }
  0x31   :  { %573 = dma.done.wait [#allocation8], 128  }
  0x32   :  { %574 = vsyncadd [#allocation8], 4294967168  ;;  %v581_v0 = vmov 0.0   ;;  %vm582_vm0 = vmmov 0   ;;  %vm80_vm1 = vcmask 64512   ;;  %v75_v1 = vld [vmem:[#allocation4] sm:$0xff] }
  0x33   :  { %446 = vmatprep.subr.mxu0 %v581_v0  ;;  %448 = vmatprep.mubr.msk.f32.mxu0 %vm582_vm0, %v581_v0  ;;  %v74_v2 = vld [vmem:[#allocation2] sm:$0xf]  ;;  %v193_v3 = vld [vmem:[#allocation6 + $0x18] sm:$0xff]  ;;  %v191_v7 = vld [vmem:[#allocation6 + $0x8] sm:$0xff]  ;;  %vm154_vm2 = vcmask 257024   ;;  %vm200_vm3 = vcmask 261120  }
  0x34   :  { %451 = vmatprep.subr.mxu1 %v581_v0  ;;  %459 = vmatprep.mubr.msk.f32.mxu1 %vm582_vm0, %v581_v0  ;;  %v197_v4 = vld [vmem:[#allocation6 + $0x38] sm:$0xff]  ;;  %v192_v5 = vld [vmem:[#allocation6 + $0x10] sm:$0xff]  ;;  %v195_v8 = vld [vmem:[#allocation6 + $0x28] sm:$0xff]  ;;  %vm350_vm4 = vcmask 517120   ;;  %vm414_vm7 = vcmask 1024  }
  0x35   :  { %447 = vmatpush3.msra.mxu0 %v75_v1  ;;  %452 = vmatpush3.msra.mxu1 %v197_v4  ;;  %v196_v6 = vld [vmem:[#allocation6 + $0x30] sm:$0xff]  ;;  %v190_v9 = vld [vmem:[#allocation6] sm:$0xff] }
  0x36   :  { %449 = vmatmul.mubr.msk.f32.vlgmr.msra.gmra.mxu0 %vm80_vm1, %v74_v2  ;;  %462 = vmatprep.subr.mxu0 %v581_v0  ;;  %v194_v10 = vld [vmem:[#allocation6 + $0x20] sm:$0xff] }
  0x37   :  { %470 = vmatprep.mubr.msk.f32.mxu0 %vm582_vm0, %v581_v0  ;;  %463 = vmatpush3.msra.mxu0 %v193_v3  ;;  %v423_v11 = vld [vmem:[#allocation7] ss:$0 sm:$0xff]  ;;  %v425_v36 = vld [vmem:[#allocation7 + $0x1] ss:$0 sm:$0xff]  ;;  %v426_v39 = vld [vmem:[#allocation7 + $0x2] ss:$0 sm:$0xff] }
  0x38   :  { %464 = vmatprep.subr.mxu0 %v581_v0  ;;  %453 = vmatprep.subr.mxu1 %v581_v0  ;;  %v429_v45 = vld [vmem:[#allocation7 + $0x3] ss:$0 sm:$0xff] }
  0x39   :  { %465 = vmatpush3.msra.mxu0 %v192_v5  ;;  %454 = vmatpush3.msra.mxu1 %v196_v6 }
  0x3a   :  { %466 = vmatprep.subr.mxu0 %v581_v0  ;;  %455 = vmatprep.subr.mxu1 %v581_v0 }
  0x3b   :  { %467 = vmatpush3.msra.mxu0 %v191_v7  ;;  %456 = vmatpush3.msra.mxu1 %v195_v8  ;;  %v430_v8 = vld [vmem:[#allocation7 + $0x4] ss:$0 sm:$0xff] }
  0x3c   :  { %468 = vmatprep.subr.mxu0 %v581_v0  ;;  %457 = vmatprep.subr.mxu1 %v581_v0 }
  0x3d   :  { %469 = vmatpush3.msra.mxu0 %v190_v9  ;;  %458 = vmatpush3.msra.mxu1 %v194_v10 }
  0xf6   :  { %v150_v12 = vpop.f32.mrf.mxu0 }
  0xf7   :  { %v151_v13 = vadd.f32 %v423_v11, %v150_v12  ;;  %v431_v11 = vld [vmem:[#allocation7 + $0x5] ss:$0 sm:$0xff] }
  0xf8   :  { %v450_v14 = vpop.f32.mrf.mxu0 }
  0xf9   :  { %v155_v15 = vsel %vm154_vm2, %v151_v13, 0.0  ;;  %v164_v16 = vmul.f32 %v151_v13, %v151_v13  ;;  %v432_v14 = vld [vmem:[#allocation7 + $0x6] ss:$0 sm:$0xff] }
  0xfa   :  { %v156_v17 = vrot.slane %v155_v15, 4 }
  0xfb   :  { %v165_v18 = vsel %vm154_vm2, %v164_v16, 0.0 }
  0xfc   :  { %v157_v19 = vadd.f32 %v156_v17, %v155_v15  ;;  %v166_v20 = vrot.slane %v165_v18, 4 }
  0xfe   :  { %v158_v21 = vrot.slane %v157_v19, 2  ;;  %v167_v22 = vadd.f32 %v166_v20, %v165_v18  ;;  %v433_v18 = vld [vmem:[#allocation7 + $0x7] ss:$0 sm:$0xff] }
 0x100   :  { %v159_v23 = vadd.f32 %v158_v21, %v157_v19  ;;  %v168_v24 = vrot.slane %v167_v22, 2 }
 0x102   :  { %v160_v25 = vrot.slane %v159_v23, 1  ;;  %v169_v26 = vadd.f32 %v168_v24, %v167_v22 }
 0x104   :  { %v161_v27 = vadd.f32 %v160_v25, %v159_v23  ;;  %v170_v28 = vrot.slane %v169_v26, 1 }
 0x106   :  { %v163_v29 = vmul.f32 0.25, %v161_v27  ;;  %v171_v30 = vadd.f32 %v170_v28, %v169_v26 }
 0x108   :  { %v172_v31 = vmul.f32 0.25, %v171_v30  ;;  %v173_v32 = vmul.f32 %v163_v29, %v163_v29  ;;  %v175_v35 = vsub.f32 %v151_v13, %v163_v29 }
 0x10a   :  { %v174_v33 = vsub.f32 %v172_v31, %v173_v32  ;;  %v180_v37 = vmul.f32 %v425_v36, %v175_v35 }
 0x10c   :  { %v181_v34 = vadd.f32 1e-05, %v174_v33 }
 0x10e   :  { %481 = vrsqrt.f32 %v181_v34 }
 0x11b   :  { %v482_v38 = vpop.eup %481 }
 0x11c   :  { %v183_v40 = vmul.f32 %v482_v38, %v180_v37 }
 0x11e   :  { %v188_v41 = vadd.f32 %v426_v39, %v183_v40 }
 0x120   :  { %v189_v42 = vmax.f32 %v188_v41, 0.0 }
 0x122   :  { %471 = vmatmul.mubr.msk.f32.vlgmr.msra.gmra.mxu0 %vm200_vm3, %v189_v42  ;;  %v199_v43 = vrot.slane %v189_v42, 2 }
 0x124   :  { %460 = vmatmul.mubr.msk.f32.vlgmr.msra.gmra.mxu1 %vm200_vm3, %v199_v43 }
 0x1e2   :  { %v341_v44 = vpop.f32.mrf.mxu0 }
 0x1e4   :  { %v269_v46 = vpop.f32.mrf.mxu1  ;;  %v472_v47 = vpop.f32.mrf.mxu0 }
 0x1e5   :  { %v342_v48 = vadd.f32 %v341_v44, %v269_v46 }
 0x1e6   :  { %v461_v49 = vpop.f32.mrf.mxu1 }
 0x1e7   :  { %v349_v50 = vadd.f32 %v429_v45, %v342_v48 }
 0x1e9   :  { %v351_v51 = vsel %vm350_vm4, %v349_v50, 0.0  ;;  %v360_v52 = vmul.f32 %v349_v50, %v349_v50 }
 0x1ea   :  { %v352_v53 = vrot.slane %v351_v51, 4 }
 0x1eb   :  { %v361_v54 = vsel %vm350_vm4, %v360_v52, 0.0 }
 0x1ec   :  { %v353_v55 = vadd.f32 %v352_v53, %v351_v51  ;;  %v362_v56 = vrot.slane %v361_v54, 4 }
 0x1ee   :  { %v354_v57 = vrot.slane %v353_v55, 2  ;;  %v363_v58 = vadd.f32 %v362_v56, %v361_v54 }
 0x1f0   :  { %v355_v59 = vadd.f32 %v354_v57, %v353_v55  ;;  %v364_v60 = vrot.slane %v363_v58, 2 }
 0x1f2   :  { %v356_v61 = vrot.slane %v355_v59, 1  ;;  %v365_v62 = vadd.f32 %v364_v60, %v363_v58 }
 0x1f4   :  { %v357_v63 = vadd.f32 %v356_v61, %v355_v59  ;;  %v366_v0 = vrot.slane %v365_v62, 1 }
 0x1f6   :  { %v359_v1 = vmul.f32 0.5, %v357_v63  ;;  %v367_v2 = vadd.f32 %v366_v0, %v365_v62 }
 0x1f8   :  { %v368_v3 = vmul.f32 0.5, %v367_v2  ;;  %v369_v4 = vmul.f32 %v359_v1, %v359_v1  ;;  %v371_v7 = vsub.f32 %v349_v50, %v359_v1 }
 0x1fa   :  { %v370_v5 = vsub.f32 %v368_v3, %v369_v4  ;;  %v376_v9 = vmul.f32 %v430_v8, %v371_v7 }
 0x1fc   :  { %v377_v6 = vadd.f32 1e-05, %v370_v5 }
 0x1fe   :  { %483 = vrsqrt.f32 %v377_v6 }
 0x20b   :  { %v484_v10 = vpop.eup %483 }
 0x20c   :  { %v379_v12 = vmul.f32 %v484_v10, %v376_v9 }
 0x20e   :  { %v384_v13 = vadd.f32 %v431_v11, %v379_v12 }
 0x210   :  { %v385_v15 = vmax.f32 %v384_v13, 0.0 }
 0x212   :  { %v390_v16 = vmul.f32 %v432_v14, %v385_v15 }
 0x214   :  { %v391_v17 = vsel %vm350_vm4, %v390_v16, 0.0 }
 0x215   :  { %392 = vadd.xlane.f32.xlu0 %v391_v17 }
 0x29e   :  { %v393_v19 = vpop.xlane.xlu0 %392 }
 0x29f   :  { %v398_v20 = vadd.f32 %v433_v18, %v393_v19 }
 0x2a1   :  { %v400_v21 = vmin.f32 %v398_v20, 20.0  ;;  %vm399_vm6 = vcmp.gt.f32.partialorder %v398_v20, 20.0 }
 0x2a3   :  { %v401_v22 = vmul.f32 1.442695, %v400_v21 }
 0x2a5   :  { %485 = vpow2.f32 %v401_v22 }
 0x2b2   :  { %v486_v23 = vpop.eup %485 }
 0x2b3   :  { %v403_v24 = vadd.f32 1.0, %v486_v23  ;;  %v406_v25 = vmul.f32 -0.5, %v486_v23  ;;  %v409_v27 = vand.u32 2147483647, %v486_v23 }
 0x2b5   :  { %487 = vlog2.f32 %v403_v24  ;;  %v407_v26 = vadd.f32 1.0, %v406_v25  ;;  %vm410_vm5 = vcmp.lt.f32.partialorder %v409_v27, 0.0004427343 }
 0x2b7   :  { %v408_v30 = vmul.f32 %v486_v23, %v407_v26 }
 0x2c2   :  { %v488_v28 = vpop.eup %487 }
 0x2c3   :  { %v405_v29 = vmul.f32 0.6931472, %v488_v28 }
 0x2c5   :  { %v411_v31 = vsel %vm410_vm5, %v408_v30, %v405_v29 }
 0x2c6   :  { %v412_v32 = vsel %vm399_vm6, %v398_v20, %v411_v31 }
 0x2c7   :  { %v413_v33 = vadd.f32 1e-06, %v412_v32 }
 0x2c9   :  { %415 = vst.msk [vmem:[%s630_s4] sm:$0x3] %vm414_vm7, %v413_v33 }
 0x2ca   :  { %420 = vsyncpa [#allocation3], 1 }
 0x2cb   :  { %421 = vsyncpa [#allocation5], 1 }
 0x2cc   :  { %422 = vsyncpa [#allocation8], 1 }

</bundles_post_ra>
